<compile_context>
chip_gen: v7x
topology: tpu7x:2x2x1
jax: 0.10.0
libtpu: 0.0.40
codegen_flags: <defaults>
</compile_context>

<pallas_src>
import functools

import jax
import jax.numpy as jnp
from jax.experimental import pallas as pl
from jax.experimental.pallas import tpu as pltpu


_SUBLANE = 8
_LANE = 128


def _erf(x):
    """erf(x) via Abramowitz & Stegun 7.1.26 (max abs error ~1.5e-7)."""
    a1 = jnp.float32(0.254829592)
    a2 = jnp.float32(-0.284496736)
    a3 = jnp.float32(1.421413741)
    a4 = jnp.float32(-1.453152027)
    a5 = jnp.float32(1.061405429)
    p = jnp.float32(0.3275911)
    sgn = jnp.where(x >= jnp.float32(0.0), jnp.float32(1.0), jnp.float32(-1.0))
    ax = jnp.abs(x)
    t = jnp.float32(1.0) / (jnp.float32(1.0) + p * ax)
    poly = ((((a5 * t + a4) * t + a3) * t + a2) * t + a1) * t
    return sgn * (jnp.float32(1.0) - poly * jnp.exp(-ax * ax))


def _model_kernel(b_ref, c_ref, u_ref, v_ref, out_ref):
    bv = b_ref[...]
    cv = c_ref[...]
    u = u_ref[...]      # uniforms for dropout mask
    v1 = v_ref[...]     # rand_like(a)

    # ---- dropout(b, p=0.5), training: keep w.p. 0.5, scale kept by 1/(1-p)=2 ----
    y = jnp.where(u >= jnp.float32(0.5), bv * jnp.float32(2.0), jnp.float32(0.0))

    # ---- gelu(c), exact erf form: 0.5 * c * (1 + erf(c / sqrt(2))) ----
    x = jnp.float32(0.5) * cv * (
        jnp.float32(1.0) + _erf(cv * jnp.float32(0.7071067811865476))
    )

    # ---- y = y + x ; x = sigmoid(y) ; t = silu(x) = x * sigmoid(x) ----
    y = y + x
    x = jax.nn.sigmoid(y)
    t = x * jax.nn.sigmoid(x)

    # ---- out = t + v1 ----
    out_ref[...] = t + v1


def _round_up(n, m):
    return ((n + m - 1) // m) * m


@functools.partial(jax.jit, static_argnames=())
def model_forward(a, b, c, key):
    """Forward pass of the PyTorch Model. a, b, c: float32 arrays, same shape (B, C, L)."""
    assert a.shape == b.shape == c.shape
    B, C, L = a.shape
    R = B * C
    Rp = _round_up(R, _SUBLANE)
    Lp = _round_up(L, _LANE)

    def prep(x):
        x2 = x.reshape(R, L).astype(jnp.float32)
        return jnp.pad(x2, ((0, Rp - R), (0, Lp - L)))

    b2 = prep(b)
    c2 = prep(c)

    # Randomness generated in the wrapper (jax.random), streamed into the kernel.
    # TODO(synk): torch would also draw the dead w1 = rand_like(b) and advance its
    # RNG; outputs here are statistically but not bitwise comparable to torch.
    k_drop, k_v1 = jax.random.split(key)
    u_drop = jax.random.uniform(k_drop, (Rp, Lp), dtype=jnp.float32)
    v1 = jax.random.uniform(k_v1, (Rp, Lp), dtype=jnp.float32)

    # Row-tiled 1-D grid; whole (padded) lane dim per block -> unmasked stores.
    tile_r = min(Rp, 256)
    grid = (pl.cdiv(Rp, tile_r),)
    row_spec = pl.BlockSpec((tile_r, Lp), lambda i: (i, 0))

    out2 = pl.pallas_call(
        _model_kernel,
        out_shape=jax.ShapeDtypeStruct((Rp, Lp), jnp.float32),
        grid=grid,
        in_specs=[row_spec, row_spec, row_spec, row_spec],  # b, c, u_drop, v1
        out_specs=row_spec,
        compiler_params=pltpu.CompilerParams(
            dimension_semantics=("parallel",),
        ),
    )(b2, c2, u_drop, v1)

    return out2[:R, :L].reshape(B, C, L)


if __name__ == "__main__":
    key = jax.random.PRNGKey(0)
    ka, kb, kc, krand = jax.random.split(key, 4)

    shape = (2, 2, 10)  # matches torch.randn(2, 2, 10)
    a = jax.random.normal(ka, shape, dtype=jnp.float32)
    b = jax.random.normal(kb, shape, dtype=jnp.float32)
    c = jax.random.normal(kc, shape, dtype=jnp.float32)

    out = model_forward(a, b, c, krand)
    out = jax.block_until_ready(out)

    assert out.shape == shape
    assert out.dtype == jnp.float32
    assert bool(jnp.all(jnp.isfinite(out)))
    # dropout output + gelu -> sigmoid in (0,1) -> silu in (0,1) -> + U[0,1) => bounded
    assert bool(jnp.all(out >= 0.0)) and bool(jnp.all(out <= 2.0))
    print("KERNEL_OK")
</pallas_src>

<mosaic_0001>
module attributes {stable_mosaic.version = 11 : i64} {
  func.func @_model_kernel(%arg0: i32, %arg1: memref<8x128xf32, #tpu.memory_space<vmem>>, %arg2: memref<8x128xf32, #tpu.memory_space<vmem>>, %arg3: memref<8x128xf32, #tpu.memory_space<vmem>>, %arg4: memref<8x128xf32, #tpu.memory_space<vmem>>, %arg5: memref<8x128xf32, #tpu.memory_space<vmem>>) attributes {dimension_semantics = [#tpu.dimension_semantics<parallel>], iteration_bounds = array<i64: 1>, scalar_prefetch = 0 : i64, scratch_operands = 0 : i64, tpu.core_type = #tpu.core_type<tc>, window_params = [{transform_indices = @transform_0, window_bounds = array<i64: 8, 128>}, {transform_indices = @transform_1, window_bounds = array<i64: 8, 128>}, {transform_indices = @transform_2, window_bounds = array<i64: 8, 128>}, {transform_indices = @transform_3, window_bounds = array<i64: 8, 128>}, {transform_indices = @transform_4, window_bounds = array<i64: 8, 128>}]} {
    %c0 = arith.constant 0 : index
    %c0_0 = arith.constant 0 : index
    %0 = vector.load %arg1[%c0, %c0_0] : memref<8x128xf32, #tpu.memory_space<vmem>>, vector<8x128xf32>
    %c0_1 = arith.constant 0 : index
    %c0_2 = arith.constant 0 : index
    %1 = vector.load %arg2[%c0_1, %c0_2] : memref<8x128xf32, #tpu.memory_space<vmem>>, vector<8x128xf32>
    %c0_3 = arith.constant 0 : index
    %c0_4 = arith.constant 0 : index
    %2 = vector.load %arg3[%c0_3, %c0_4] : memref<8x128xf32, #tpu.memory_space<vmem>>, vector<8x128xf32>
    %c0_5 = arith.constant 0 : index
    %c0_6 = arith.constant 0 : index
    %3 = vector.load %arg4[%c0_5, %c0_6] : memref<8x128xf32, #tpu.memory_space<vmem>>, vector<8x128xf32>
    %cst = arith.constant 5.000000e-01 : f32
    %4 = vector.broadcast %cst : f32 to vector<8x128xf32>
    %5 = arith.cmpf oge, %2, %4 : vector<8x128xf32>
    %cst_7 = arith.constant 2.000000e+00 : f32
    %6 = vector.broadcast %cst_7 : f32 to vector<8x128xf32>
    %7 = arith.mulf %0, %6 : vector<8x128xf32>
    %cst_8 = arith.constant 0.000000e+00 : f32
    %8 = vector.broadcast %cst_8 : f32 to vector<8x128xf32>
    %9 = arith.select %5, %7, %8 : vector<8x128xi1>, vector<8x128xf32>
    %cst_9 = arith.constant 5.000000e-01 : f32
    %10 = vector.broadcast %cst_9 : f32 to vector<8x128xf32>
    %11 = arith.mulf %10, %1 : vector<8x128xf32>
    %cst_10 = arith.constant 0.707106769 : f32
    %12 = vector.broadcast %cst_10 : f32 to vector<8x128xf32>
    %13 = arith.mulf %1, %12 : vector<8x128xf32>
    %cst_11 = arith.constant 0.000000e+00 : f32
    %14 = vector.broadcast %cst_11 : f32 to vector<8x128xf32>
    %15 = arith.cmpf oge, %13, %14 : vector<8x128xf32>
    %cst_12 = arith.constant 1.000000e+00 : f32
    %cst_13 = arith.constant -1.000000e+00 : f32
    %16 = vector.broadcast %cst_12 : f32 to vector<8x128xf32>
    %17 = vector.broadcast %cst_13 : f32 to vector<8x128xf32>
    %18 = arith.select %15, %16, %17 : vector<8x128xi1>, vector<8x128xf32>
    %19 = math.absf %13 : vector<8x128xf32>
    %cst_14 = arith.constant 0.327591091 : f32
    %20 = vector.broadcast %cst_14 : f32 to vector<8x128xf32>
    %21 = arith.mulf %20, %19 : vector<8x128xf32>
    %cst_15 = arith.constant 1.000000e+00 : f32
    %22 = vector.broadcast %cst_15 : f32 to vector<8x128xf32>
    %23 = arith.addf %22, %21 : vector<8x128xf32>
    %cst_16 = arith.constant 1.000000e+00 : f32
    %24 = vector.broadcast %cst_16 : f32 to vector<8x128xf32>
    %25 = arith.divf %24, %23 : vector<8x128xf32>
    %cst_17 = arith.constant 1.06140542 : f32
    %26 = vector.broadcast %cst_17 : f32 to vector<8x128xf32>
    %27 = arith.mulf %26, %25 : vector<8x128xf32>
    %cst_18 = arith.constant -1.45315206 : f32
    %28 = vector.broadcast %cst_18 : f32 to vector<8x128xf32>
    %29 = arith.addf %27, %28 : vector<8x128xf32>
    %30 = arith.mulf %29, %25 : vector<8x128xf32>
    %cst_19 = arith.constant 1.42141378 : f32
    %31 = vector.broadcast %cst_19 : f32 to vector<8x128xf32>
    %32 = arith.addf %30, %31 : vector<8x128xf32>
    %33 = arith.mulf %32, %25 : vector<8x128xf32>
    %cst_20 = arith.constant -0.284496725 : f32
    %34 = vector.broadcast %cst_20 : f32 to vector<8x128xf32>
    %35 = arith.addf %33, %34 : vector<8x128xf32>
    %36 = arith.mulf %35, %25 : vector<8x128xf32>
    %cst_21 = arith.constant 0.254829586 : f32
    %37 = vector.broadcast %cst_21 : f32 to vector<8x128xf32>
    %38 = arith.addf %36, %37 : vector<8x128xf32>
    %39 = arith.mulf %38, %25 : vector<8x128xf32>
    %cst_22 = arith.constant 0.000000e+00 : f32
    %40 = vector.broadcast %cst_22 : f32 to vector<8x128xf32>
    %41 = arith.subf %40, %19 : vector<8x128xf32>
    %42 = arith.mulf %41, %19 : vector<8x128xf32>
    %43 = math.exp %42 : vector<8x128xf32>
    %44 = arith.mulf %39, %43 : vector<8x128xf32>
    %cst_23 = arith.constant 1.000000e+00 : f32
    %45 = vector.broadcast %cst_23 : f32 to vector<8x128xf32>
    %46 = arith.subf %45, %44 : vector<8x128xf32>
    %47 = arith.mulf %18, %46 : vector<8x128xf32>
    %cst_24 = arith.constant 1.000000e+00 : f32
    %48 = vector.broadcast %cst_24 : f32 to vector<8x128xf32>
    %49 = arith.addf %48, %47 : vector<8x128xf32>
    %50 = arith.mulf %11, %49 : vector<8x128xf32>
    %51 = arith.addf %9, %50 : vector<8x128xf32>
    %52 = arith.negf %51 : vector<8x128xf32>
    %53 = math.exp %52 : vector<8x128xf32>
    %cst_25 = arith.constant 1.000000e+00 : f32
    %54 = vector.broadcast %cst_25 : f32 to vector<8x128xf32>
    %55 = arith.addf %54, %53 : vector<8x128xf32>
    %56 = arith.divf %54, %55 : vector<8x128xf32>
    %57 = arith.negf %56 : vector<8x128xf32>
    %58 = math.exp %57 : vector<8x128xf32>
    %cst_26 = arith.constant 1.000000e+00 : f32
    %59 = vector.broadcast %cst_26 : f32 to vector<8x128xf32>
    %60 = arith.addf %59, %58 : vector<8x128xf32>
    %61 = arith.divf %59, %60 : vector<8x128xf32>
    %62 = arith.mulf %56, %61 : vector<8x128xf32>
    %63 = arith.addf %62, %3 : vector<8x128xf32>
    %c0_27 = arith.constant 0 : index
    %c0_28 = arith.constant 0 : index
    %64 = vector.load %arg5[%c0_27, %c0_28] : memref<8x128xf32, #tpu.memory_space<vmem>>, vector<8x128xf32>
    tpu.vector_store %arg5[%c0_27, %c0_28], %63 {strides = array<i32>} : memref<8x128xf32, #tpu.memory_space<vmem>>, vector<8x128xf32>,
    return
  }
  func.func @transform_0(%arg0: i32) -> (i32, i32) {
    %c0_i32 = arith.constant 0 : i32
    %c0_i32_0 = arith.constant 0 : i32
    return %arg0, %c0_i32 : i32, i32
  }
  func.func @transform_1(%arg0: i32) -> (i32, i32) {
    %c0_i32 = arith.constant 0 : i32
    %c0_i32_0 = arith.constant 0 : i32
    return %arg0, %c0_i32 : i32, i32
  }
  func.func @transform_2(%arg0: i32) -> (i32, i32) {
    %c0_i32 = arith.constant 0 : i32
    %c0_i32_0 = arith.constant 0 : i32
    return %arg0, %c0_i32 : i32, i32
  }
  func.func @transform_3(%arg0: i32) -> (i32, i32) {
    %c0_i32 = arith.constant 0 : i32
    %c0_i32_0 = arith.constant 0 : i32
    return %arg0, %c0_i32 : i32, i32
  }
  func.func @transform_4(%arg0: i32) -> (i32, i32) {
    %c0_i32 = arith.constant 0 : i32
    %c0_i32_0 = arith.constant 0 : i32
    return %arg0, %c0_i32 : i32, i32
  }
}

</mosaic_0001>

<bundles_post_ra>
// kernel: model_forward.3
= control target key start
LH: loop header
LB: loop body
LE: loop exit
PB: predicated region body
PF: predicated region fallthrough
CT: control target
= control target key end

     0   :  { %v86_v22 = vmov -1.0   ;;  %s127_s1 = inlined_call_operand.vmem [shape: f32[8,128], index: 1, kind: input, shape index: {}]   ;;  %s128_s0 = inlined_call_operand.vmem [shape: f32[8,128], index: 0, kind: input, shape index: {}]   ;;  %s129_s2 = inlined_call_operand.vmem [shape: f32[8,128], index: 2, kind: input, shape index: {}]   ;;  %s130_s3 = inlined_call_operand.vmem [shape: f32[8,128], index: 3, kind: input, shape index: {}]   ;;  %s131_s4 = inlined_call_operand.vmem [shape: f32[8,128], index: 4, kind: output, shape index: {}]  }
   0x1   :  { %v18_v0 = vld [vmem:[%s127_s1] sm:$0xff] }
   0x2   :  { %v25_v1 = vmul.f32 0.70710677, %v18_v0  ;;  %v17_v19 = vld [vmem:[%s128_s0] sm:$0xff]  ;;  %v24_v26 = vmul.f32 0.5, %v18_v0 }
   0x3   :  { %v19_v21 = vld [vmem:[%s129_s2] sm:$0xff]  ;;  %v22_v25 = vmul.f32 2.0, %v17_v19 }
   0x4   :  { %v28_v2 = vand.u32 2147483647, %v25_v1  ;;  %vm26_vm0 = vcmp.ge.f32.partialorder %v25_v1, 0.0  ;;  %vm21_vm1 = vcmp.ge.f32.partialorder %v19_v21, 0.5  ;;  %v20_v40 = vld [vmem:[%s130_s3] sm:$0xff] }
   0x5   :  { %v27_v23 = vsel %vm26_vm0, 1.0, %v86_v22  ;;  %v23_v29 = vsel %vm21_vm1, %v22_v25, 0.0 }
   0x6   :  { %v29_v3 = vmul.f32 0.3275911, %v28_v2  ;;  %v42_v5 = vsub.f32 0.0, %v28_v2 }
   0x8   :  { %v30_v4 = vadd.f32 1.0, %v29_v3  ;;  %v43_v6 = vmul.f32 %v42_v5, %v28_v2 }
   0xa   :  { %74 = vrcp.f32 %v30_v4  ;;  %v44_v9 = vmul.f32 1.442695, %v43_v6 }
   0xc   :  { %76 = vpow2.f32 %v44_v9 }
  0x14   :  { %v75_v7 = vpop.eup %74 }
  0x15   :  { %v33_v8 = vmul.f32 1.0614054, %v75_v7 }
  0x16   :  { %v77_v17 = vpop.eup %76 }
  0x17   :  { %v34_v10 = vadd.f32 -1.4531521, %v33_v8 }
  0x19   :  { %v35_v11 = vmul.f32 %v75_v7, %v34_v10 }
  0x1b   :  { %v36_v12 = vadd.f32 1.4214138, %v35_v11 }
  0x1d   :  { %v37_v13 = vmul.f32 %v75_v7, %v36_v12 }
  0x1f   :  { %v38_v14 = vadd.f32 -0.28449672, %v37_v13 }
  0x21   :  { %v39_v15 = vmul.f32 %v75_v7, %v38_v14 }
  0x23   :  { %v40_v16 = vadd.f32 0.2548296, %v39_v15 }
  0x25   :  { %v41_v18 = vmul.f32 %v75_v7, %v40_v16 }
  0x27   :  { %v46_v20 = vmul.f32 %v77_v17, %v41_v18 }
  0x29   :  { %v47_v24 = vsub.f32 1.0, %v46_v20 }
  0x2b   :  { %v48_v27 = vmul.f32 %v47_v24, %v27_v23 }
  0x2d   :  { %v49_v28 = vadd.f32 1.0, %v48_v27 }
  0x2f   :  { %v50_v30 = vmul.f32 %v49_v28, %v24_v26 }
  0x31   :  { %v51_v31 = vadd.f32 %v50_v30, %v23_v29 }
  0x33   :  { %v71_v32 = vmul.f32 -1.442695, %v51_v31 }
  0x35   :  { %78 = vpow2.f32 %v71_v32 }
  0x3f   :  { %v79_v33 = vpop.eup %78 }
  0x40   :  { %v55_v34 = vadd.f32 1.0, %v79_v33 }
  0x42   :  { %80 = vrcp.f32 %v55_v34 }
  0x4c   :  { %v81_v35 = vpop.eup %80 }
  0x4d   :  { %v72_v36 = vmul.f32 -1.442695, %v81_v35 }
  0x4f   :  { %82 = vpow2.f32 %v72_v36 }
  0x59   :  { %v83_v37 = vpop.eup %82 }
  0x5a   :  { %v61_v38 = vadd.f32 1.0, %v83_v37 }
  0x5c   :  { %84 = vrcp.f32 %v61_v38 }
  0x66   :  { %v85_v39 = vpop.eup %84 }
  0x67   :  { %v64_v41 = vmul.f32 %v85_v39, %v81_v35 }
  0x69   :  { %v65_v42 = vadd.f32 %v64_v41, %v20_v40 }
  0x6b   :  { %66 = vst [vmem:[%s131_s4] sm:$0xff] %v65_v42 }

</bundles_post_ra>
